<compile_context>
chip_gen: v6e
topology: v6e:2x2x1
jax: 0.10.0
libtpu: 0.0.40
codegen_flags: <defaults>
</compile_context>

<pallas_src>
import functools
import math

import jax
import jax.numpy as jnp
from jax.experimental import pallas as pl
from jax.experimental.pallas import tpu as pltpu


_NEG_INF = -1e30  # finite "masked" value: exp() underflows to 0, never produces NaN


# --------------------------------------------------------------------------- kernels
def _qkv_proj_kernel(x_ref, w_ref, b_ref, qkv_ref):
    # x_ref: (1, ts, D)   w_ref: (1, D, D)   b_ref: (1, 1, D)   qkv_ref: (1, 1, ts, D)
    y = jnp.dot(x_ref[0], w_ref[0], preferred_element_type=jnp.float32)
    qkv_ref[0, 0] = (y + b_ref[0]).astype(qkv_ref.dtype)


def _flash_out_kernel(q_ref, k_ref, v_ref, wo_ref, bo_ref, o_ref,
                      m_sc, l_sc, acc_sc, *, n_heads, d_head, causal):
    # q_ref: (1,1,tq,D)  k_ref/v_ref: (1,1,tk,D)  wo_ref: (D,D)  bo_ref: (1,D)
    # o_ref: (1,tq,D)    scratch: m/l (H,tq,1) f32, acc (H,tq,dh) f32
    qi = pl.program_id(1)
    ki = pl.program_id(2)
    tq = q_ref.shape[2]
    tk = k_ref.shape[2]

    @pl.when(ki == 0)
    def _init():
        m_sc[...] = jnp.full_like(m_sc, -jnp.inf)
        l_sc[...] = jnp.zeros_like(l_sc)
        acc_sc[...] = jnp.zeros_like(acc_sc)

    def _update():
        q = q_ref[0, 0]                      # (tq, D) -- Q already scaled by 1/sqrt(dh)
        k = k_ref[0, 0]                      # (tk, D)
        v = v_ref[0, 0]                      # (tk, D)
        if causal:
            row = qi * tq + jax.lax.broadcasted_iota(jnp.int32, (tq, tk), 0)
            col = ki * tk + jax.lax.broadcasted_iota(jnp.int32, (tq, tk), 1)
            causal_mask = col > row          # shared by every head; computed once
        for h in range(n_heads):             # static unrolled loop over heads
            sl = slice(h * d_head, (h + 1) * d_head)
            # scores = q_h @ k_h^T without materializing a transpose (contract on dh)
            s = jax.lax.dot_general(q[:, sl], k[:, sl], (((1,), (1,)), ((), ())),
                                    preferred_element_type=jnp.float32)   # (tq, tk)
            if causal:
                s = jnp.where(causal_mask, _NEG_INF, s)
            m_prev = m_sc[h]
            m_new = jnp.maximum(m_prev, jnp.max(s, axis=-1, keepdims=True))
            alpha = jnp.exp(m_prev - m_new)
            p = jnp.exp(s - m_new)
            l_sc[h] = alpha * l_sc[h] + jnp.sum(p, axis=-1, keepdims=True)
            acc_sc[h] = alpha * acc_sc[h] + jnp.dot(
                p.astype(v.dtype), v[:, sl], preferred_element_type=jnp.float32)
            m_sc[h] = m_new

    if causal:
        # Skip compute for kv tiles lying entirely above the diagonal of this q tile.
        # (Their K/V DMAs are also elided via the clamped index_map in the wrapper.)
        @pl.when(ki * tk <= qi * tq + (tq - 1))
        def _():
            _update()
    else:
        _update()

    @pl.when(ki == pl.num_programs(2) - 1)
    def _finalize():
        heads = []
        for h in range(n_heads):
            l = l_sc[h]
            inv = pl.reciprocal(l, approx=True)     # EUP slot (free)
            inv = inv * (2.0 - l * inv)             # one Newton step -> ~f32-exact
            heads.append(acc_sc[h] * inv)
        merged = jnp.concatenate(heads, axis=-1)    # (tq, D), head-contiguous
        # Fused output projection: one full-depth matmul instead of H shallow ones.
        y = jnp.dot(merged.astype(wo_ref.dtype), wo_ref[...],
                    preferred_element_type=jnp.float32)
        o_ref[0] = (y + bo_ref[...]).astype(o_ref.dtype)


# --------------------------------------------------------------------------- wrapper
def _pick_tile(dim, target):
    """Largest tile <= target that divides dim and is a multiple of 8 (or the full dim)."""
    t = min(target, dim)
    if t == dim:
        return t
    t -= t % 8
    while t >= 8:
        if dim % t == 0:
            return t
        t -= 8
    return dim


def self_attention(x, w_in, b_in, w_out, b_out, *, n_heads, causal_mask=False,
                   q_block=512, kv_block=512, seq_block=512, vmem_limit_bytes=None):
    """Forward of the PyTorch SelfAttention module.

    x     : (B, S, D)
    w_in  : (3D, D)   PyTorch Linear layout (y = x @ W.T + b)
    b_in  : (3D,)
    w_out : (D, D)
    b_out : (D,)
    """
    B, S, D = x.shape
    H = n_heads
    dh = D // H
    assert D == H * dh, "d_embed must be divisible by n_heads"
    dtype = x.dtype
    itemsize = jnp.dtype(dtype).itemsize

    ts = _pick_tile(S, seq_block)   # projection seq tile
    tq = _pick_tile(S, q_block)     # attention q tile
    tk = _pick_tile(S, kv_block)    # attention kv tile

    def _cparams(dims):
        kw = dict(dimension_semantics=dims)
        if vmem_limit_bytes is not None:
            kw["vmem_limit_bytes"] = vmem_limit_bytes
        return pltpu.CompilerParams(**kw)

    # ---- one-time weight prep (plain XLA; constant-folded for fixed params) ----
    scale = 1.0 / math.sqrt(dh)
    chunk_scale = jnp.asarray([scale, 1.0, 1.0], w_in.dtype).reshape(3, 1, 1)
    # (3D, D) -> (D, 3D) -> (3, D, D); fold 1/sqrt(dh) into the Q chunk.
    w_qkv = jnp.transpose(w_in.T.reshape(D, 3, D), (1, 0, 2)) * chunk_scale
    b_qkv = b_in.reshape(3, 1, D) * chunk_scale
    w_o = w_out.T                    # (D, D): rows are head-contiguous input features
    b_o = b_out.reshape(1, D)

    # ---- 1) QKV projection: full-width matmul, lane-dense (ts, D) writes ----
    # Chunk axis outermost -> each chunk weight is DMA'd once (block index constant
    # across the inner (B, S_tiles) steps) instead of once per sequence tile.
    qkv = pl.pallas_call(
        _qkv_proj_kernel,
        out_shape=jax.ShapeDtypeStruct((3, B, S, D), dtype),
        grid_spec=pltpu.PrefetchScalarGridSpec(
            num_scalar_prefetch=0,
            grid=(3, B, S // ts),
            in_specs=[
                pl.BlockSpec((1, ts, D), lambda c, b, si: (b, si, 0)),
                pl.BlockSpec((1, D, D), lambda c, b, si: (c, 0, 0)),
                pl.BlockSpec((1, 1, D), lambda c, b, si: (c, 0, 0)),
            ],
            out_specs=pl.BlockSpec((1, 1, ts, D), lambda c, b, si: (c, b, si, 0)),
        ),
        compiler_params=_cparams(("parallel", "parallel", "parallel")),
        cost_estimate=pl.CostEstimate(
            flops=2 * 3 * B * S * D * D,
            transcendentals=0,
            bytes_accessed=int((3 * B * S * D      # x streamed once per chunk
                                + 3 * D * D        # weights streamed once
                                + 3 * B * S * D    # qkv written once
                                + 3 * D) * itemsize),
        ),
    )(x, w_qkv, b_qkv)

    # ---- 2) Flash attention + fused output projection ----
    nq, nk = S // tq, S // tk

    if causal_mask:
        def _kv_block(ki, qi):
            # Clamp to the last valid kv tile for this q tile so fully-masked tiles
            # alias the previously fetched block -> their DMAs are elided.
            return jnp.minimum(ki, (qi * tq + tq - 1) // tk)
        k_map = lambda b, qi, ki: (1, b, _kv_block(ki, qi), 0)
        v_map = lambda b, qi, ki: (2, b, _kv_block(ki, qi), 0)
    else:
        k_map = lambda b, qi, ki: (1, b, ki, 0)
        v_map = lambda b, qi, ki: (2, b, ki, 0)

    out = pl.pallas_call(
        functools.partial(_flash_out_kernel, n_heads=H, d_head=dh,
                          causal=causal_mask),
        out_shape=jax.ShapeDtypeStruct((B, S, D), dtype),
        grid_spec=pltpu.PrefetchScalarGridSpec(
            num_scalar_prefetch=0,
            grid=(B, nq, nk),
            in_specs=[
                pl.BlockSpec((1, 1, tq, D), lambda b, qi, ki: (0, b, qi, 0)),   # Q
                pl.BlockSpec((1, 1, tk, D), k_map),                             # K
                pl.BlockSpec((1, 1, tk, D), v_map),                             # V
                pl.BlockSpec((D, D), lambda b, qi, ki: (0, 0)),                 # w_out^T
                pl.BlockSpec((1, D), lambda b, qi, ki: (0, 0)),                 # b_out
            ],
            out_specs=pl.BlockSpec((1, tq, D), lambda b, qi, ki: (b, qi, 0)),
            scratch_shapes=[
                pltpu.VMEM((H, tq, 1), jnp.float32),    # running max  m (per head)
                pltpu.VMEM((H, tq, 1), jnp.float32),    # running sum  l (per head)
                pltpu.VMEM((H, tq, dh), jnp.float32),   # accumulator    (per head)
            ],
        ),
        compiler_params=_cparams(("parallel", "parallel", "arbitrary")),
        cost_estimate=pl.CostEstimate(
            flops=4 * B * H * S * S * dh + 2 * B * S * D * D,
            transcendentals=B * H * S * S,
            # Q once, K/V re-streamed once per q tile, output once, w_out once.
            bytes_accessed=int((B * S * D * (2 + 2 * nq) + D * D + D) * itemsize),
        ),
    )(qkv, qkv, qkv, w_o, b_o)
    return out


# --------------------------------------------------------------------------- reference
def self_attention_ref(x, w_in, b_in, w_out, b_out, *, n_heads, causal_mask=False):
    """Plain-JAX reference mirroring the PyTorch forward exactly."""
    B, S, D = x.shape
    d_head = D // n_heads
    qkv = jnp.einsum('bsd,ed->bse', x, w_in) + b_in
    q, k, v = jnp.split(qkv, 3, axis=-1)

    def heads(t):
        return t.reshape(B, S, n_heads, d_head).transpose(0, 2, 1, 3)

    q, k, v = heads(q), heads(k), heads(v)
    w = jnp.einsum('bhqd,bhkd->bhqk', q, k)
    if causal_mask:
        row = jax.lax.broadcasted_iota(jnp.int32, (S, S), 0)
        col = jax.lax.broadcasted_iota(jnp.int32, (S, S), 1)
        w = jnp.where((col > row)[None, None], -jnp.inf, w)
    w = w / math.sqrt(d_head)
    w = jax.nn.softmax(w, axis=-1)
    out = jnp.einsum('bhqk,bhkd->bhqd', w, v)
    out = out.transpose(0, 2, 1, 3).reshape(B, S, D)
    return jnp.einsum('bsd,ed->bse', out, w_out) + b_out


# --------------------------------------------------------------------------- demo/test
if __name__ == "__main__":
    # Small shapes consistent with the module: batch=2, seq=8, d_embed=32, heads=4.
    B, S, D, H = 2, 8, 32, 4

    key = jax.random.PRNGKey(0)
    kx, k1, k2, k3, k4 = jax.random.split(key, 5)

    x = jax.random.normal(kx, (B, S, D), dtype=jnp.float32)

    bound = 1.0 / math.sqrt(D)
    w_in = jax.random.uniform(k1, (3 * D, D), jnp.float32, -bound, bound)
    b_in = jax.random.uniform(k2, (3 * D,), jnp.float32, -bound, bound)
    w_out = jax.random.uniform(k3, (D, D), jnp.float32, -bound, bound)
    b_out = jax.random.uniform(k4, (D,), jnp.float32, -bound, bound)

    out = jax.block_until_ready(
        self_attention(x, w_in, b_in, w_out, b_out, n_heads=H, causal_mask=False))
    ref = self_attention_ref(x, w_in, b_in, w_out, b_out, n_heads=H, causal_mask=False)
    assert out.shape == (B, S, D)
    assert jnp.allclose(out, ref, atol=1e-4, rtol=1e-4), \
        float(jnp.max(jnp.abs(out - ref)))

    # Causal-mask branch (exercises the per-tile mask + DMA-eliding tile-skip path).
    out_c = jax.block_until_ready(
        self_attention(x, w_in, b_in, w_out, b_out, n_heads=H, causal_mask=True))
    ref_c = self_attention_ref(x, w_in, b_in, w_out, b_out, n_heads=H, causal_mask=True)
    assert jnp.allclose(out_c, ref_c, atol=1e-4, rtol=1e-4), \
        float(jnp.max(jnp.abs(out_c - ref_c)))

    print("KERNEL_OK")
</pallas_src>

<mosaic_0001>
module attributes {stable_mosaic.version = 11 : i64} {
  func.func @_qkv_proj_kernel(%arg0: i32, %arg1: i32, %arg2: i32, %arg3: memref<1x8x32xf32, #tpu.memory_space<vmem>>, %arg4: memref<1x32x32xf32, #tpu.memory_space<vmem>>, %arg5: memref<1x1x32xf32, #tpu.memory_space<vmem>>, %arg6: memref<1x1x8x32xf32, #tpu.memory_space<vmem>>) attributes {dimension_semantics = [#tpu.dimension_semantics<parallel>, #tpu.dimension_semantics<parallel>, #tpu.dimension_semantics<parallel>], iteration_bounds = array<i64: 3, 2, 1>, scalar_prefetch = 0 : i64, scratch_operands = 0 : i64, tpu.core_type = #tpu.core_type<tc>, window_params = [{transform_indices = @transform_0, window_bounds = array<i64: 1, 8, 32>}, {transform_indices = @transform_1, window_bounds = array<i64: 1, 32, 32>}, {transform_indices = @transform_2, window_bounds = array<i64: 1, 1, 32>}, {transform_indices = @transform_3, window_bounds = array<i64: 1, 1, 8, 32>}]} {
    %c0 = arith.constant 0 : index
    %c0_0 = arith.constant 0 : index
    %c0_1 = arith.constant 0 : index
    %0 = vector.load %arg3[%c0, %c0_0, %c0_1] : memref<1x8x32xf32, #tpu.memory_space<vmem>>, vector<1x8x32xf32>
    %1 = vector.shape_cast %0 : vector<1x8x32xf32> to vector<8x32xf32>
    %c0_2 = arith.constant 0 : index
    %c0_3 = arith.constant 0 : index
    %c0_4 = arith.constant 0 : index
    %2 = vector.load %arg4[%c0_2, %c0_3, %c0_4] : memref<1x32x32xf32, #tpu.memory_space<vmem>>, vector<1x32x32xf32>
    %3 = vector.shape_cast %2 : vector<1x32x32xf32> to vector<32x32xf32>
    %cst = arith.constant dense<0.000000e+00> : vector<8x32xf32>
    %4 = tpu.matmul %1, %3, %cst {dimension_numbers = #tpu.dot_dimension_numbers<[1], [0], [0], [1], [0, 0, 1, 1], [], []>} : vector<8x32xf32>, vector<32x32xf32>, vector<8x32xf32> -> vector<8x32xf32>
    %c0_5 = arith.constant 0 : index
    %c0_6 = arith.constant 0 : index
    %c0_7 = arith.constant 0 : index
    %5 = vector.load %arg5[%c0_5, %c0_6, %c0_7] : memref<1x1x32xf32, #tpu.memory_space<vmem>>, vector<1x1x32xf32>
    %6 = vector.shape_cast %5 : vector<1x1x32xf32> to vector<1x32xf32>
    %7 = vector.broadcast %6 : vector<1x32xf32> to vector<8x32xf32>
    %8 = arith.addf %4, %7 : vector<8x32xf32>
    %c0_8 = arith.constant 0 : index
    %c0_9 = arith.constant 0 : index
    %c0_10 = arith.constant 0 : index
    %c0_11 = arith.constant 0 : index
    %9 = vector.load %arg6[%c0_8, %c0_9, %c0_10, %c0_11] : memref<1x1x8x32xf32, #tpu.memory_space<vmem>>, vector<1x1x8x32xf32>
    %10 = vector.shape_cast %9 : vector<1x1x8x32xf32> to vector<8x32xf32>
    %11 = vector.shape_cast %8 : vector<8x32xf32> to vector<1x1x8x32xf32>
    tpu.vector_store %arg6[%c0_8, %c0_9, %c0_10, %c0_11], %11 {strides = array<i32>} : memref<1x1x8x32xf32, #tpu.memory_space<vmem>>, vector<1x1x8x32xf32>,
    return
  }
  func.func @transform_0(%arg0: i32, %arg1: i32, %arg2: i32) -> (i32, i32, i32) {
    %c0_i32 = arith.constant 0 : i32
    %c0_i32_0 = arith.constant 0 : i32
    return %arg1, %arg2, %c0_i32 : i32, i32, i32
  }
  func.func @transform_1(%arg0: i32, %arg1: i32, %arg2: i32) -> (i32, i32, i32) {
    %c0_i32 = arith.constant 0 : i32
    %c0_i32_0 = arith.constant 0 : i32
    %c0_i32_1 = arith.constant 0 : i32
    return %arg0, %c0_i32, %c0_i32_0 : i32, i32, i32
  }
  func.func @transform_2(%arg0: i32, %arg1: i32, %arg2: i32) -> (i32, i32, i32) {
    %c0_i32 = arith.constant 0 : i32
    %c0_i32_0 = arith.constant 0 : i32
    %c0_i32_1 = arith.constant 0 : i32
    return %arg0, %c0_i32, %c0_i32_0 : i32, i32, i32
  }
  func.func @transform_3(%arg0: i32, %arg1: i32, %arg2: i32) -> (i32, i32, i32, i32) {
    %c0_i32 = arith.constant 0 : i32
    %c0_i32_0 = arith.constant 0 : i32
    return %arg0, %arg1, %arg2, %c0_i32 : i32, i32, i32, i32
  }
}

</mosaic_0001>

<bundles_post_ra>
// kernel: tpu_custom_call.1
= control target key start
LH: loop header
LB: loop body
LE: loop exit
PB: predicated region body
PF: predicated region fallthrough
CT: control target
= control target key end

     0   :  { %s1170_s0 = inlined_call_operand.hbm [shape: f32[2,8,32], index: 0, kind: input, shape index: {}]   ;;  %s1171_s1 = inlined_call_operand.hbm [shape: f32[3,32,32], index: 1, kind: input, shape index: {}]   ;;  %s1172_s2 = inlined_call_operand.vmem [shape: f32[3,1,32], index: 2, kind: input, shape index: {}]   ;;  %s1173_s3 = inlined_call_operand.hbm [shape: f32[3,2,8,32], index: 3, kind: output, shape index: {}]  }
   0x1   :  { %1181 = sst [smem:[#allocation19_spill]] %s1170_s0 }
   0x2   :  { %8 = vsyncpa [#allocation3], 0 }
   0x3   :  { %10 = vsyncpa [#allocation3 + $0x1], 0 }
   0x4   :  { %11 = vsyncpa [#allocation6], 0 }
   0x5   :  { %13 = vsyncpa [#allocation6 + $0x1], 0 }
   0x6   :  { %14 = vsyncpa [#allocation4], 0 }
   0x7   :  { %16 = vsyncpa [#allocation4 + $0x1], 0  ;;  %s895_s12 = smov 0   ;;  %s897_s13 = smov 0  }
   0x8   :  { %s899_s14 = smov 0   ;;  %s901_s15 = smov 0  }
   0x9   :  { %s903_s16 = smov 0   ;;  %s905_s17 = smov 0  }
   0xa   :  { %s907_s18 = smov 0   ;;  %s909_s19 = smov 0  }
   0xb   :  { %s911_s20 = smov 0   ;;  %s913_s21 = smov 0  }
   0xc   :  { %s915_s22 = smov 0   ;;  %s917_s23 = smov 0  }
   0xd   :  { %s919_s24 = smov 0   ;;  %s921_s25 = smov 0  }
   0xe LB: > { %1182 = sst [smem:[#allocation11_spill]] %s822_s14  ;;  %s490_s26 = sadd.s32 4294967295, %s866_s25   ;;  %s866_s25 = sphi %s921_s25, %s22_s25   ;;  %s862_s24 = sphi %s919_s24, %s1221_s24   ;;  %s858_s23 = sphi %s917_s23, %s1211_s23   ;;  %s854_s22 = sphi %s915_s22, %s1220_s22   ;;  %s850_s21 = sphi %s913_s21, %s1210_s21   ;;  %s846_s20 = sphi %s911_s20, %s1209_s20   ;;  %s842_s19 = sphi %s909_s19, %s1219_s19   ;;  %s838_s18 = sphi %s907_s18, %s1218_s18   ;;  %s834_s17 = sphi %s905_s17, %s1217_s17   ;;  %s830_s16 = sphi %s903_s16, %s1216_s16   ;;  %s826_s15 = sphi %s901_s15, %s1215_s15   ;;  %s822_s14 = sphi %s899_s14, %s1206_s14   ;;  %s818_s13 = sphi %s897_s13, %s1214_s13   ;;  %s814_s12 = sphi %s895_s12, %s1213_s12  }
   0xf   : > { %1183 = sst [smem:[#allocation12_spill]] %s846_s20  ;;  %s37_s28 = sadd.s32 1, %s858_s23 }
  0x10   : > { %1184 = sst [smem:[#allocation13_spill]] %s858_s23  ;;  %s41_s29 = sadd.s32 1, %s862_s24 }
  0x11   : > { %p39_p0 = scmp.ge.s32.totalorder %s37_s28, 2  ;;  %s50_s30 = sadd.s32 1, %s846_s20 }
  0x12   : > { %p57_p1 = scmp.ne.s32.totalorder %s846_s20, %s842_s19  ;;  %p58_p2 = scmp.eq.s32.totalorder %s866_s25, 0 }
  0x13   : > { %s1223_s28 = smov (%p39_p0, %s37_s28), 0  ;;  %s1225_s29 = smov (!%p39_p0, %s41_s29), %s862_s24 }
  0x14   : > { %1185 = sst [smem:[#allocation14_spill]] %s1223_s28  ;;  %s45_s4 = ssub.s32 %s858_s23, %s1223_s28 }
  0x15   : > { %p978_p3 = por %p58_p2, %p57_p1  ;;  %p43_p4 = scmp.ge.s32.totalorder %s1225_s29, 3 }
  0x16   : > { %p48_p5 = scmp.eq.s32.totalorder %s45_s4, 0  ;;  %p63_p6 = scmp.ne.s32.totalorder %s842_s19, %s838_s18 }
  0x17   : > { %p64_p7 = scmp.eq.s32.totalorder %s490_s26, 0  ;;  %s1227_s29 = smov (%p43_p4, %s1225_s29), 0 }
  0x18   : > { %1187 = sst [smem:[#allocation15_spill]] %s1227_s29  ;;  %s73_s8 = ssub.s32 %s862_s24, %s1227_s29 }
  0x19   : > { %s988_s6 = scalar_select %p48_p5, %s846_s20, %s50_s30  }
  0x1a   : > { %p990_p8 = por %p64_p7, %p63_p6  ;;  %p74_p9 = scmp.eq.s32.totalorder %s73_s8, 0 }
  0x1b   : > { %1188 = sst [smem:[#allocation16_spill]] %s988_s6  ;;  %s76_s9 = sadd.s32 1, %s834_s17 }
  0x1c   : > { %p83_p10 = scmp.ne.s32.totalorder %s834_s17, %s830_s16  ;;  %p89_p11 = scmp.ne.s32.totalorder %s830_s16, %s826_s15 }
  0x1d   : > { %s1002_s10 = scalar_select %p74_p9, %s834_s17, %s76_s9  }
  0x1e   : > { %p1006_p12 = por %p83_p10, %p58_p2  ;;  %p1010_p13 = por %p89_p11, %p64_p7 }
  0x1f   : > { %1190 = sst [smem:[#allocation17_spill]] %s1002_s10  ;;  %s127_s30 = sor.u32 %s73_s8, %s45_s4 }
  0x20   : > { %s1192_s18 = scalar_select %p1010_p13, 1, 0 }
  0x21   : > { %s132_s27 = sadd.s32 1, %s822_s14  ;;  %p130_p0 = scmp.eq.s32.totalorder %s127_s30, 0 }
  0x22   : > { %p142_p1 = scmp.ne.s32.totalorder %s822_s14, %s818_s13  ;;  %p143_p4 = scmp.eq.s32.totalorder %s490_s26, 5 }
  0x23   : > { %p148_p5 = scmp.ne.s32.totalorder %s818_s13, %s814_s12  ;;  %s1195_s29 = sadd.s32 4294967294, %s866_s25  }
  0x24   : > { %s1022_s15 = scalar_select %p130_p0, %s822_s14, %s132_s27  }
  0x25   : > { %p1024_p2 = por %p143_p4, %p142_p1  ;;  %p149_p6 = scmp.eq.s32.totalorder %s1195_s29, 5 }
  0x26   : > { %1193 = sst [smem:[#allocation18_spill]] %s1022_s15  ;;  %p544_p7 = scmp.lt.s32.totalorder %s866_s25, 6 }
  0x27   : > { %s1194_s9 = scalar_select %p1024_p2, 1, 0 }
  0x28   : > { %p1031_p9 = por %p149_p6, %p148_p5  ;;  %s169_s8 = sand.u32 1, %s846_s20  }
  0x29   : > { %s494_s30 = sshll.u32 %s169_s8, 3  ;;  %s495_s28 = sshll.u32 %s858_s23, 7 }
  0x2a   : > { %s1196_s4 = scalar_select %p1031_p9, 1, 0 }
  0x2b   : > { %s1197_s0 = sld [smem:[#allocation19_spill]]  ;;  %s173_s27 = scalar_lea.vmem [#allocation2], %s494_s30 }
  0x2c   : > { %s181_s15 = sshll.u32 %s173_s27, 4  ;;  %p1042_p10 = pnand %p544_p7, %p978_p3  ;;  %s182_s15 = int_to_ptr.vmem [resolvable:$true] %s181_s15 }
  0x2d   : > { %p1048_p11 = pnand %p544_p7, %p1006_p12  ;;  %p499_p0 = scmp.ge.s32.totalorder %s866_s25, 1 }
  0x2e   : > { %p213_p1 = scmp.lt.s32.totalorder %s866_s25, 7  ;;  %s170_s23 = scalar_lea.sflag [#allocation3], %s169_s8 }
  0x2f   : > { %p664_p4 = pneg %p1042_p10  ;;  %s868_s5 = smov [#allocation2]  }
  0x30   : > { %s680_s6 = sshll.u32 %s868_s5, 4  ;;  %s681_s6 = int_to_ptr.vmem [resolvable:$false] %s680_s6 }
  0x31   : > { %s179_s10 = scalar_lea.hbm %s1197_s0, %s495_s28  ;;  %s675_s28 = scalar_lea.vmem %s182_s15, 128 }
  0x32   : > { %p676_p5 = scmp.ne.s32.totalorder %s182_s15, %s675_s28  ;;  %s682_s30 = scalar_lea.vmem %s681_s6, 256 }
  0x33   : > { %p683_p3 = scmp.lt.s32.totalorder %s182_s15, %s681_s6  ;;  %p684_p2 = scmp.lt.s32.totalorder %s682_s30, %s675_s28 }
  0x34   : > { %p678_p6 = pnand %p676_p5, %p664_p4 }
  0x35   : > { %p685_p13 = por %p684_p2, %p683_p3 }
  0x36   : > { %p679_p9 = pneg %p678_p6 }
  0x38   : > { %p686_p12 = pnand %p685_p13, %p679_p9 }
  0x3a   : > { %689 = shalt.err (!%p686_p12)
}
  0x3b   : > { %536 = dma.hbm_to_vmem [thread:$0]  (!%p1042_p10), %s179_s10, 128, %s182_s15, %s170_s23  }
  0x3c   : > { %p1062_p7 = pnand %p499_p0, %p213_p1  ;;  %s188_s8 = sand.u32 1, %s834_s17  }
  0x3d   : > { %s510_s26 = sshll.u32 %s862_s24, 9  ;;  %s496_s27 = sshll.u32 %s188_s8, 5 }
  0x3e   : > { %s198_s6 = scalar_lea.hbm %s1171_s1, %s510_s26  ;;  %s192_s14 = scalar_lea.vmem [#allocation5], %s496_s27 }
  0x3f   : > { %s199_s30 = sshll.u32 %s192_s14, 4  ;;  %s189_s0 = scalar_lea.sflag [#allocation6], %s188_s8  ;;  %s200_s30 = int_to_ptr.vmem [resolvable:$true] %s199_s30 }
  0x40   : > { %p692_p13 = pneg %p1048_p11  ;;  %s703_s23 = scalar_lea.vmem %s200_s30, 512 }
  0x41   : > { %p704_p2 = scmp.ne.s32.totalorder %s200_s30, %s703_s23  ;;  %s869_s10 = smov [#allocation5]  }
  0x42   : > { %s708_s15 = sshll.u32 %s869_s10, 4  ;;  %s709_s15 = int_to_ptr.vmem [resolvable:$false] %s708_s15 }
  0x43   : > { %p706_p9 = pnand %p704_p2, %p692_p13  ;;  %s710_s20 = scalar_lea.vmem %s709_s15, 1024 }
  0x44   : > { %p711_p0 = scmp.lt.s32.totalorder %s200_s30, %s709_s15  ;;  %p712_p1 = scmp.lt.s32.totalorder %s710_s20, %s703_s23 }
  0x45   : > { %p707_p10 = pneg %p706_p9 }
  0x46   : > { %p713_p4 = por %p712_p1, %p711_p0 }
  0x48   : > { %p714_p5 = pnand %p713_p4, %p707_p10 }
  0x4a   : > { %717 = shalt.err (!%p714_p5)
}
  0x4b   : > { %s870_s26 = smov 128   ;;  %s871_s27 = smov 8  }
  0x4c   : > { %539 = dma.hbm_to_vmem [thread:$0]  (!%p1048_p11), %s198_s6, 512, %s200_s30, %s189_s0, %s870_s26, %s870_s26, %s871_s27  }
  0x4d   : > { %217 = sbr.rel (%p1062_p7) target bundleno = 304 (0x130), region = 32  ;;  %s219_s8 = sand.u32 (!%p1062_p7), 1, %s842_s19  }
  0x4e   : > { %s500_s28 = sshll.u32 (!%p1062_p7), %s219_s8, 3  ;;  %s220_s5 = scalar_lea.sflag (!%p1062_p7), [#allocation3], %s219_s8 }
  0x4f   : > { %s223_s14 = scalar_lea.vmem (!%p1062_p7), [#allocation2], %s500_s28 }
  0x52   : > { %801 = dma.done.wait (%p990_p8), %s220_s5, 128  }
  0x53   : > { %803 = vsyncadd (%p990_p8), %s220_s5, 4294967168  ;;  %s228_s20 = sand.u32 1, %s830_s16   ;;  %p1201_p11 = scmp.ne.s32.totalorder %s1192_s18, 0 }
  0x54   : > { %s501_s23 = sshll.u32 %s228_s20, 5  ;;  %s229_s29 = scalar_lea.sflag [#allocation6], %s228_s20 }
  0x55   : > { %s232_s0 = scalar_lea.vmem [#allocation5], %s501_s23 }
  0x56   : > { %805 = dma.done.wait (%p1201_p11), %s229_s29, 512  }
  0x57   : > { %807 = vsyncadd (%p1201_p11), %s229_s29, 4294966784  ;;  %v872_v0 = vmov 0.0   ;;  %vm873_vm0 = vmmov 0   ;;  %v270_v1 = vld [vmem:[%s232_s0 + $0x18] sm:$0xff]  ;;  %v269_v2 = vld [vmem:[%s232_s0 + $0x10] sm:$0xff]  ;;  %vm278_vm1 = vcmask 261120  }
  0x58   : > { %516 = vmatprep.subr.mxu0 %v872_v0  ;;  %524 = vmatprep.mubr.msk.f32.mxu0 %vm873_vm0, %v872_v0  ;;  %v268_v3 = vld [vmem:[%s232_s0 + $0x8] sm:$0xff]  ;;  %v267_v4 = vld [vmem:[%s232_s0] sm:$0xff]  ;;  %v266_v5 = vld [vmem:[%s223_s14] sm:$0xff]  ;;  %p263_p8 = scmp.lt.s32.totalorder %s854_s22, 2  ;;  %s260_s7 = sand.u32 1, %s818_s13  }
  0x59   : > { %517 = vmatpush3.msra.mxu0 %v270_v1  ;;  %s502_s11 = sshll.u32 %s260_s7, 3  ;;  %s506_s6 = sshll.u32 %s854_s22, 1 }
  0x5a   : > { %518 = vmatprep.subr.mxu0 %v872_v0  ;;  %s264_s18 = scalar_select %p263_p8, %s854_s22, 2 }
  0x5b   : > { %519 = vmatpush3.msra.mxu0 %v269_v2  ;;  %s366_s26 = sadd.s32 %s850_s21, %s506_s6  ;;  %s262_s8 = scalar_lea.vmem [#allocation7], %s502_s11 }
  0x5c   : > { %520 = vmatprep.subr.mxu0 %v872_v0  ;;  %s265_s15 = scalar_lea.vmem %s1172_s2, %s264_s18  ;;  %s507_s27 = sshll.u32 %s366_s26, 7 }
  0x5d   : > { %521 = vmatpush3.msra.mxu0 %v268_v3  ;;  %v503_v6 = vld [vmem:[%s265_s15] ss:$0 sm:$0xff]  ;;  %s370_s28 = sshll.u32 %s262_s8, 4  ;;  %s1099_s20 = scalar_lea.hbm %s1173_s3, %s507_s27  ;;  %s371_s28 = int_to_ptr.vmem [resolvable:$true] %s370_s28 }
  0x5e   : > { %522 = vmatprep.subr.mxu0 %v872_v0  ;;  %s354_s22 = scalar_lea.sflag [#allocation4], %s260_s7  ;;  %s718_s23 = scalar_lea.vmem %s371_s28, 128 }
  0x5f   : > { %523 = vmatpush3.msra.mxu0 %v267_v4  ;;  %p719_p6 = scmp.ne.s32.totalorder %s371_s28, %s718_s23  ;;  %p1202_p3 = scmp.ne.s32.totalorder %s1194_s9, 0 }
  0x60   : > { %525 = vmatmul.mubr.msk.f32.vlgmr.msra.gmra.mxu0 %vm278_vm1, %v266_v5  ;;  %s874_s21 = smov [#allocation7]  }
  0x61   : > { %p720_p12 = pnand %p719_p6, %p1202_p3  ;;  %s722_s29 = sshll.u32 %s874_s21, 4  ;;  %s723_s29 = int_to_ptr.vmem [resolvable:$false] %s722_s29 }
  0x62   : > { %s724_s0 = scalar_lea.vmem %s723_s29, 256  ;;  %p725_p13 = scmp.lt.s32.totalorder %s371_s28, %s723_s29 }
  0x63   : > { %p721_p7 = pneg %p720_p12  ;;  %p726_p2 = scmp.lt.s32.totalorder %s724_s0, %s718_s23 }
  0x65   : > { %p727_p9 = por %p726_p2, %p725_p13 }
  0x67   : > { %p728_p10 = pnand %p727_p9, %p721_p7 }
 0x120   : > { %v348_v7 = vpop.f32.mrf.mxu0 }
 0x121   : > { %v349_v8 = vadd.f32 %v503_v6, %v348_v7 }
 0x122   : > { %v526_v9 = vpop.f32.mrf.mxu0 }
 0x123   : > { %352 = vst.msk [vmem:[%s262_s8] sm:$0xff] %vm278_vm1, %v349_v8 }
 0x124   : > { %731 = shalt.err (!%p728_p10)
}
 0x125   : > { %s732_s18 = scalar_lea.hbm %s1099_s20, 128  ;;  %s736_s6 = scalar_lea.hbm %s1173_s3, 768 }
 0x126   : > { %p733_p0 = scmp.ne.s32.totalorder %s1099_s20, %s732_s18  ;;  %p737_p5 = scmp.lt.s32.totalorder %s1099_s20, %s1173_s3 }
 0x127   : > { %p738_p11 = scmp.lt.s32.totalorder %s736_s6, %s732_s18 }
 0x128   : > { %p734_p1 = pnand %p733_p0, %p1202_p3 }
 0x129   : > { %p739_p8 = por %p738_p11, %p737_p5 }
 0x12a   : > { %p735_p4 = pneg %p734_p1 }
 0x12c   : > { %p740_p6 = pnand %p739_p8, %p735_p4 }
 0x12e   : > { %743 = shalt.err (!%p740_p6)
}
 0x12f   : > { %531 = dma.vmem_to_hbm [thread:$0]  (%p1202_p3), %s371_s28, 128, %s1099_s20, %s354_s22  }
 0x130 PF: > { %p545_p12 = scmp.ge.s32.totalorder %s866_s25, 2  ;;  %s382_s15 = sand.u32 1, %s814_s12  }
 0x131   : > { %p1203_p7 = scmp.ne.s32.totalorder %s1196_s4, 0  ;;  %s383_s26 = scalar_lea.sflag [#allocation4], %s382_s15 }
 0x133   : > { %p541_p13 = pnand %p545_p12, %p1203_p7 }
 0x135   : > { %p542_p2 = pneg %p541_p13 }
 0x137   : > { %809 = dma.done.wait (%p542_p2), %s383_s26, 128  }
 0x138   : > { %811 = vsyncadd (%p542_p2), %s383_s26, 4294967168  ;;  %s22_s25 = sadd.s32 1, %s866_s25   ;;  %s1205_s9 = sld [smem:[#allocation11_spill]] }
 0x139   : > { %p1123_p9 = scmp.ge.s32.totalorder %s22_s25, 8   ;;  %s1206_s14 = sld [smem:[#allocation18_spill]] }
 0x13a   : > { %s1207_s8 = sld [smem:[#allocation17_spill]]  ;;  %s1213_s12 = smov %s818_s13 }
 0x13b   : > { %s1208_s28 = sld [smem:[#allocation12_spill]]  ;;  %s1215_s15 = smov %s830_s16 }
 0x13c   : > { %s1209_s20 = sld [smem:[#allocation16_spill]]  ;;  %s1216_s16 = smov %s834_s17 }
 0x13d   : > { %s1210_s21 = sld [smem:[#allocation13_spill]]  ;;  %s1218_s18 = smov %s842_s19 }
 0x13e   : > { %s1211_s23 = sld [smem:[#allocation14_spill]]  ;;  %s1214_s13 = smov %s1205_s9 }
 0x13f   : > { %s1212_s4 = sld [smem:[#allocation15_spill]]  ;;  %s1220_s22 = smov %s862_s24 }
 0x140   : > { %s1217_s17 = smov %s1207_s8 }
 0x141   : > { %s1219_s19 = smov %s1208_s28  ;;  %21 = sbr.rel (!%p1123_p9) target bundleno = 14 (0xe), region = 93 }
 0x145   : > { %s1221_s24 = smov %s1212_s4 }
 0x146   :  { %388 = vsyncpa [#allocation3], 1 }
 0x147   :  { %390 = vsyncpa [#allocation3 + $0x1], 1 }
 0x148   :  { %391 = vsyncpa [#allocation6], 1 }
 0x149   :  { %393 = vsyncpa [#allocation6 + $0x1], 1 }
 0x14a   :  { %394 = vsyncpa [#allocation4], 1 }
 0x14b   :  { %396 = vsyncpa [#allocation4 + $0x1], 1 }

</bundles_post_ra>
